<compile_context>
chip_gen: v7x
topology: tpu7x:2x2x1
jax: 0.10.0
libtpu: 0.0.40
codegen_flags: <defaults>
</compile_context>

<pallas_src>
import jax
import jax.numpy as jnp
from jax import lax
from jax.experimental import pallas as pl
from jax.experimental.pallas import tpu as pltpu

# ---------------- configuration (small, consistent with the module) --------
USER_NUM = 32
ITEM_NUM = 48
FACTOR_NUM = 8
NUM_LAYERS = 3
DROPOUT = 0.0            # p=0.0 -> dropout is exactly the identity
BATCH = 16

EMBED_DIM = FACTOR_NUM * 2 ** (NUM_LAYERS - 1)                               # 32
LAYER_IN = [FACTOR_NUM * 2 ** (NUM_LAYERS - i) for i in range(NUM_LAYERS)]   # 64, 32, 16
LAYER_OUT = [s // 2 for s in LAYER_IN]                                       # 32, 16, 8
L1, L2, L3 = LAYER_OUT                                                       # 32, 16, 8
CONCAT_IN = USER_NUM + ITEM_NUM                                              # 80

# ---------------- packed-parameter layout (all row offsets 8-aligned) ------
ROW_A = 0                        # folded layer-1 weight [A_u | A_i] : (L1, 80)
ROW_W2 = ROW_A + L1              # W2 : (L2, L1)
ROW_W3 = ROW_W2 + L2             # W3 : (L3, L2)
ROW_B1 = ROW_W3 + L3             # b1 : (L1, 1)
ROW_B2 = ROW_B1 + L1             # b2 : (L2, 1)
ROW_B3 = ROW_B2 + L2             # b3 : (L3, 1)
ROW_WP = ROW_B3 + L3             # predict weight as column : (L3, 1)
ROW_BP = ROW_WP + L3             # predict bias : (1, 1)
PACK_ROWS = ((ROW_BP + 1 + 7) // 8) * 8          # 128
PACK_COLS = max(CONCAT_IN, L1)                   # 80

MAX_TILE_B = 4096        # batch tile ceiling; multiple of 128 (lane-dense)
MIN_SPLIT_B = 512        # above this, force >= 2 grid steps (v7x megacore)

# flops per batch element: 2*(32*80 + 16*32 + 8*16 + 8) ~ 6416
FLOPS_PER_ELEM = 2 * (L1 * CONCAT_IN + L2 * L1 + L3 * L2 + L3)


def _round_up(x, m):
    return ((x + m - 1) // m) * m


def _choose_tile(batch):
    """Pick a lane-dense batch tile; keep >=2 grid steps for larger batches."""
    if batch <= MIN_SPLIT_B:
        return _round_up(max(batch, 1), 128)          # single tile
    return min(MAX_TILE_B, _round_up((batch + 1) // 2, 128))


# ---------------- Pallas kernel: fully fused forward ------------------------
def mlp_fused_kernel(params_ref, idx_ref, out_ref):
    tile = out_ref.shape[1]
    f32 = jnp.float32

    # --- unpack parameters (static, sublane-aligned slices of one buffer) ---
    a = params_ref[ROW_A:ROW_A + L1, 0:CONCAT_IN]            # (32, 80)
    w2 = params_ref[ROW_W2:ROW_W2 + L2, 0:L1]                # (16, 32)
    w3 = params_ref[ROW_W3:ROW_W3 + L3, 0:L2]                # (8, 16)
    b1 = params_ref[ROW_B1:ROW_B1 + L1, 0:1]                 # (32, 1)
    b2 = params_ref[ROW_B2:ROW_B2 + L2, 0:1]                 # (16, 1)
    b3 = params_ref[ROW_B3:ROW_B3 + L3, 0:1]                 # (8, 1)
    wp = params_ref[ROW_WP:ROW_WP + L3, 0:1]                 # (8, 1)
    bp = params_ref[ROW_BP:ROW_BP + 1, 0:1]                  # (1, 1)

    # --- indices: row 0 = user id, row 1 = item id, batch on the lane axis --
    idx = idx_ref[...]                                       # (2, tile) i32
    u_row = idx[0:1, :]                                      # (1, tile)
    i_row = idx[1:2, :]                                      # (1, tile)

    # --- single stacked one-hot (80, tile); embeddings are pre-folded into A
    row_ids = lax.broadcasted_iota(jnp.int32, (CONCAT_IN, tile), 0)
    target = jnp.where(row_ids < USER_NUM, u_row, i_row + USER_NUM)
    oh = jnp.where(row_ids == target, 1.0, 0.0).astype(f32)  # (80, tile)

    # Dropout(p=0.0) is the identity.
    # TODO(synk): training-mode dropout (p>0) would need pltpu.prng_* masking
    # (and would invalidate the embedding->W1 fold).

    # --- 3-layer tower: one K=80 matmul replaces gather+concat+layer1 -------
    h = jnp.maximum(jnp.dot(a, oh, preferred_element_type=f32) + b1, 0.0)   # (32, tile)
    h = jnp.maximum(jnp.dot(w2, h, preferred_element_type=f32) + b2, 0.0)   # (16, tile)
    h = jnp.maximum(jnp.dot(w3, h, preferred_element_type=f32) + b3, 0.0)   # (8, tile)

    # --- predict layer: VPU multiply + sublane reduce (no N=1 MXU pass) -----
    out_ref[...] = jnp.sum(h * wp, axis=0, keepdims=True) + bp              # (1, tile)


# ---------------- wrapper: batch-tiled pallas_call --------------------------
def neural_cf_mlp_forward(user, item, packed_params):
    B = user.shape[0]
    tile_b = _choose_tile(B)
    b_pad = _round_up(B, tile_b)

    # one combined index array, one pad (only if the last tile is ragged)
    idx = jnp.stack([user.astype(jnp.int32), item.astype(jnp.int32)], axis=0)  # (2, B)
    if b_pad != B:
        idx = jnp.pad(idx, ((0, 0), (0, b_pad - B)))      # pad slots use id 0

    cost = pl.CostEstimate(
        flops=FLOPS_PER_ELEM * b_pad,
        transcendentals=0,
        bytes_accessed=12 * b_pad + PACK_ROWS * PACK_COLS * 4,
    )

    out = pl.pallas_call(
        mlp_fused_kernel,
        out_shape=jax.ShapeDtypeStruct((1, b_pad), jnp.float32),
        grid_spec=pltpu.PrefetchScalarGridSpec(
            num_scalar_prefetch=0,
            grid=(b_pad // tile_b,),
            in_specs=[
                # packed params: constant index_map -> VMEM-resident across steps
                pl.BlockSpec((PACK_ROWS, PACK_COLS), lambda i: (0, 0)),
                pl.BlockSpec((2, tile_b), lambda i: (0, i)),
            ],
            out_specs=pl.BlockSpec((1, tile_b), lambda i: (0, i)),
        ),
        compiler_params=pltpu.CompilerParams(
            dimension_semantics=("parallel",),
            vmem_limit_bytes=32 * 1024 * 1024,
        ),
        cost_estimate=cost,
    )(packed_params, idx)

    return out[0, :B]


# ---------------- parameter init (PyTorch layouts & default inits) ----------
def init_params(key):
    ks = jax.random.split(key, 10)

    embed_user = 0.01 * jax.random.normal(ks[0], (USER_NUM, EMBED_DIM), jnp.float32)
    embed_item = 0.01 * jax.random.normal(ks[1], (ITEM_NUM, EMBED_DIM), jnp.float32)

    def xavier_uniform(k, fan_out, fan_in):
        lim = (6.0 / (fan_in + fan_out)) ** 0.5
        return jax.random.uniform(k, (fan_out, fan_in), jnp.float32, -lim, lim)

    def linear_bias(k, fan_in, fan_out):      # nn.Linear default bias init
        lim = 1.0 / (fan_in ** 0.5)
        return jax.random.uniform(k, (fan_out,), jnp.float32, -lim, lim)

    linears = []
    kidx = 2
    for i in range(NUM_LAYERS):
        fi, fo = LAYER_IN[i], LAYER_OUT[i]
        w = xavier_uniform(ks[kidx], fo, fi); kidx += 1
        b = linear_bias(ks[kidx], fi, fo); kidx += 1
        linears.append((w, b))

    # predict layer: kaiming_uniform(a=1, nonlinearity='sigmoid') -> gain = 1
    fan_in = FACTOR_NUM
    lim = (3.0 / fan_in) ** 0.5
    wp = jax.random.uniform(ks[kidx], (1, fan_in), jnp.float32, -lim, lim); kidx += 1
    bp = jax.random.uniform(ks[kidx], (1,), jnp.float32,
                            -1.0 / fan_in ** 0.5, 1.0 / fan_in ** 0.5)

    return embed_user, embed_item, linears, (wp, bp)


def pack_params(embed_user, embed_item, linears, predict):
    (w1, b1), (w2, b2), (w3, b3) = linears
    wp, bp = predict

    # Fold the embedding tables into layer 1 (valid for inference / p=0 dropout):
    #   h1 = W1u @ eu_T + W1i @ ei_T + b1 = (W1u @ Eu.T) @ u_oh + (W1i @ Ei.T) @ i_oh + b1
    a_u = w1[:, :EMBED_DIM] @ embed_user.T            # (L1, USER_NUM)
    a_i = w1[:, EMBED_DIM:] @ embed_item.T            # (L1, ITEM_NUM)
    a = jnp.concatenate([a_u, a_i], axis=1)           # (L1, 80)

    pack = jnp.zeros((PACK_ROWS, PACK_COLS), jnp.float32)

    def put(p, arr, row):
        r, c = arr.shape
        return p.at[row:row + r, 0:c].set(arr)

    pack = put(pack, a, ROW_A)
    pack = put(pack, w2, ROW_W2)
    pack = put(pack, w3, ROW_W3)
    pack = put(pack, b1.reshape(-1, 1), ROW_B1)
    pack = put(pack, b2.reshape(-1, 1), ROW_B2)
    pack = put(pack, b3.reshape(-1, 1), ROW_B3)
    pack = put(pack, wp.reshape(-1, 1), ROW_WP)
    pack = put(pack, bp.reshape(1, 1), ROW_BP)
    return pack


# ---------------- pure-JAX reference for correctness check ------------------
def reference_forward(user, item, embed_user, embed_item, linears, predict):
    (w1, b1), (w2, b2), (w3, b3) = linears
    wp, bp = predict
    eu = jnp.take(embed_user, user, axis=0)
    ei = jnp.take(embed_item, item, axis=0)
    h = jnp.concatenate([eu, ei], axis=-1)
    h = jnp.maximum(h @ w1.T + b1, 0.0)
    h = jnp.maximum(h @ w2.T + b2, 0.0)
    h = jnp.maximum(h @ w3.T + b3, 0.0)
    return (h @ wp.T + bp).reshape(-1)


if __name__ == "__main__":
    key = jax.random.PRNGKey(0)
    pkey, ukey, ikey, ukey2, ikey2 = jax.random.split(key, 5)

    embed_user, embed_item, linears, predict = init_params(pkey)
    packed = pack_params(embed_user, embed_item, linears, predict)

    # small batch (single tile)
    user = jax.random.randint(ukey, (BATCH,), 0, USER_NUM, dtype=jnp.int32)
    item = jax.random.randint(ikey, (BATCH,), 0, ITEM_NUM, dtype=jnp.int32)
    out = jax.block_until_ready(neural_cf_mlp_forward(user, item, packed))
    ref = reference_forward(user, item, embed_user, embed_item, linears, predict)
    assert out.shape == (BATCH,)
    assert jnp.allclose(out, ref, atol=2e-5, rtol=1e-3), (out, ref)

    # larger batch: exercises multi-step grid + ragged last-tile padding
    B2 = 600
    user2 = jax.random.randint(ukey2, (B2,), 0, USER_NUM, dtype=jnp.int32)
    item2 = jax.random.randint(ikey2, (B2,), 0, ITEM_NUM, dtype=jnp.int32)
    out2 = jax.block_until_ready(neural_cf_mlp_forward(user2, item2, packed))
    ref2 = reference_forward(user2, item2, embed_user, embed_item, linears, predict)
    assert out2.shape == (B2,)
    assert jnp.allclose(out2, ref2, atol=2e-5, rtol=1e-3), (out2, ref2)

    print("KERNEL_OK")
</pallas_src>

<mosaic_0001>
module attributes {stable_mosaic.version = 11 : i64} {
  func.func @mlp_fused_kernel(%arg0: i32, %arg1: memref<128x80xf32, #tpu.memory_space<vmem>>, %arg2: memref<2x128xi32, #tpu.memory_space<vmem>>, %arg3: memref<1x128xf32, #tpu.memory_space<vmem>>) attributes {dimension_semantics = [#tpu.dimension_semantics<parallel>], iteration_bounds = array<i64: 1>, scalar_prefetch = 0 : i64, scratch_operands = 0 : i64, tpu.core_type = #tpu.core_type<tc>, window_params = [{pipeline_mode = #tpu.pipeline_mode<synchronous>, transform_indices = @transform_0, window_bounds = array<i64: 128, 80>}, {transform_indices = @transform_1, window_bounds = array<i64: 2, 128>}, {transform_indices = @transform_2, window_bounds = array<i64: 1, 128>}]} {
    %c0 = arith.constant 0 : index
    %c0_0 = arith.constant 0 : index
    %0 = vector.load %arg1[%c0, %c0_0] : memref<128x80xf32, #tpu.memory_space<vmem>>, vector<32x80xf32>
    %c32 = arith.constant 32 : index
    %c0_1 = arith.constant 0 : index
    %1 = vector.load %arg1[%c32, %c0_1] : memref<128x80xf32, #tpu.memory_space<vmem>>, vector<16x32xf32>
    %c48 = arith.constant 48 : index
    %c0_2 = arith.constant 0 : index
    %2 = vector.load %arg1[%c48, %c0_2] : memref<128x80xf32, #tpu.memory_space<vmem>>, vector<8x16xf32>
    %c56 = arith.constant 56 : index
    %c0_3 = arith.constant 0 : index
    %3 = vector.load %arg1[%c56, %c0_3] : memref<128x80xf32, #tpu.memory_space<vmem>>, vector<32x1xf32>
    %c88 = arith.constant 88 : index
    %c0_4 = arith.constant 0 : index
    %4 = vector.load %arg1[%c88, %c0_4] : memref<128x80xf32, #tpu.memory_space<vmem>>, vector<16x1xf32>
    %c104 = arith.constant 104 : index
    %c0_5 = arith.constant 0 : index
    %5 = vector.load %arg1[%c104, %c0_5] : memref<128x80xf32, #tpu.memory_space<vmem>>, vector<8x1xf32>
    %c112 = arith.constant 112 : index
    %c0_6 = arith.constant 0 : index
    %6 = vector.load %arg1[%c112, %c0_6] : memref<128x80xf32, #tpu.memory_space<vmem>>, vector<8x1xf32>
    %c120 = arith.constant 120 : index
    %c0_7 = arith.constant 0 : index
    %7 = vector.load %arg1[%c120, %c0_7] : memref<128x80xf32, #tpu.memory_space<vmem>>, vector<1x1xf32>
    %c0_8 = arith.constant 0 : index
    %c0_9 = arith.constant 0 : index
    %8 = vector.load %arg2[%c0_8, %c0_9] : memref<2x128xi32, #tpu.memory_space<vmem>>, vector<2x128xi32>
    %9 = vector.extract_strided_slice %8 {offsets = [0, 0], sizes = [1, 128], strides = [1, 1]} : vector<2x128xi32> to vector<1x128xi32>
    %10 = vector.extract_strided_slice %8 {offsets = [1, 0], sizes = [1, 128], strides = [1, 1]} : vector<2x128xi32> to vector<1x128xi32>
    %11 = tpu.iota {dimensions = array<i32: 0>} : vector<80x128xi32>
    %c32_i32 = arith.constant 32 : i32
    %12 = vector.broadcast %c32_i32 : i32 to vector<80x128xi32>
    %13 = arith.cmpi slt, %11, %12 : vector<80x128xi32>
    %c32_i32_10 = arith.constant 32 : i32
    %14 = vector.broadcast %c32_i32_10 : i32 to vector<1x128xi32>
    %15 = arith.addi %10, %14 : vector<1x128xi32>
    %16 = vector.shape_cast %9 : vector<1x128xi32> to vector<1x128xi32>
    %17 = vector.broadcast %16 : vector<1x128xi32> to vector<80x128xi32>
    %18 = vector.shape_cast %15 : vector<1x128xi32> to vector<1x128xi32>
    %19 = vector.broadcast %18 : vector<1x128xi32> to vector<80x128xi32>
    %20 = arith.select %13, %17, %19 : vector<80x128xi1>, vector<80x128xi32>
    %21 = arith.cmpi eq, %11, %20 : vector<80x128xi32>
    %cst = arith.constant 1.000000e+00 : f32
    %cst_11 = arith.constant 0.000000e+00 : f32
    %22 = vector.broadcast %cst : f32 to vector<80x128xf32>
    %23 = vector.broadcast %cst_11 : f32 to vector<80x128xf32>
    %24 = arith.select %21, %22, %23 : vector<80x128xi1>, vector<80x128xf32>
    %cst_12 = arith.constant dense<0.000000e+00> : vector<32x128xf32>
    %25 = tpu.matmul %0, %24, %cst_12 {dimension_numbers = #tpu.dot_dimension_numbers<[1], [0], [0], [1], [0, 0, 1, 1], [], []>} : vector<32x80xf32>, vector<80x128xf32>, vector<32x128xf32> -> vector<32x128xf32>
    %26 = vector.broadcast %3 : vector<32x1xf32> to vector<32x128xf32>
    %27 = arith.addf %25, %26 : vector<32x128xf32>
    %cst_13 = arith.constant 0.000000e+00 : f32
    %28 = vector.broadcast %cst_13 : f32 to vector<32x128xf32>
    %29 = arith.maximumf %27, %28 : vector<32x128xf32>
    %cst_14 = arith.constant dense<0.000000e+00> : vector<16x128xf32>
    %30 = tpu.matmul %1, %29, %cst_14 {dimension_numbers = #tpu.dot_dimension_numbers<[1], [0], [0], [1], [0, 0, 1, 1], [], []>} : vector<16x32xf32>, vector<32x128xf32>, vector<16x128xf32> -> vector<16x128xf32>
    %31 = vector.broadcast %4 : vector<16x1xf32> to vector<16x128xf32>
    %32 = arith.addf %30, %31 : vector<16x128xf32>
    %cst_15 = arith.constant 0.000000e+00 : f32
    %33 = vector.broadcast %cst_15 : f32 to vector<16x128xf32>
    %34 = arith.maximumf %32, %33 : vector<16x128xf32>
    %cst_16 = arith.constant dense<0.000000e+00> : vector<8x128xf32>
    %35 = tpu.matmul %2, %34, %cst_16 {dimension_numbers = #tpu.dot_dimension_numbers<[1], [0], [0], [1], [0, 0, 1, 1], [], []>} : vector<8x16xf32>, vector<16x128xf32>, vector<8x128xf32> -> vector<8x128xf32>
    %36 = vector.broadcast %5 : vector<8x1xf32> to vector<8x128xf32>
    %37 = arith.addf %35, %36 : vector<8x128xf32>
    %cst_17 = arith.constant 0.000000e+00 : f32
    %38 = vector.broadcast %cst_17 : f32 to vector<8x128xf32>
    %39 = arith.maximumf %37, %38 : vector<8x128xf32>
    %40 = vector.broadcast %6 : vector<8x1xf32> to vector<8x128xf32>
    %41 = arith.mulf %39, %40 : vector<8x128xf32>
    %cst_18 = arith.constant dense<0.000000e+00> : vector<128xf32>
    %42 = vector.multi_reduction <add>, %41, %cst_18 [0] : vector<8x128xf32> to vector<128xf32>
    %43 = vector.shape_cast %42 : vector<128xf32> to vector<1x128xf32>
    %44 = vector.broadcast %7 : vector<1x1xf32> to vector<1x128xf32>
    %45 = arith.addf %43, %44 : vector<1x128xf32>
    %c0_19 = arith.constant 0 : index
    %c0_20 = arith.constant 0 : index
    %46 = vector.load %arg3[%c0_19, %c0_20] : memref<1x128xf32, #tpu.memory_space<vmem>>, vector<1x128xf32>
    tpu.vector_store %arg3[%c0_19, %c0_20], %45 {strides = array<i32>} : memref<1x128xf32, #tpu.memory_space<vmem>>, vector<1x128xf32>,
    return
  }
  func.func @transform_0(%arg0: i32) -> (i32, i32) {
    %c0_i32 = arith.constant 0 : i32
    %c0_i32_0 = arith.constant 0 : i32
    %c0_i32_1 = arith.constant 0 : i32
    return %c0_i32, %c0_i32_0 : i32, i32
  }
  func.func @transform_1(%arg0: i32) -> (i32, i32) {
    %c0_i32 = arith.constant 0 : i32
    %c0_i32_0 = arith.constant 0 : i32
    return %c0_i32, %arg0 : i32, i32
  }
  func.func @transform_2(%arg0: i32) -> (i32, i32) {
    %c0_i32 = arith.constant 0 : i32
    %c0_i32_0 = arith.constant 0 : i32
    return %c0_i32, %arg0 : i32, i32
  }
}

</mosaic_0001>

<bundles_post_ra>
// kernel: tpu_custom_call.1
= control target key start
LH: loop header
LB: loop body
LE: loop exit
PB: predicated region body
PF: predicated region fallthrough
CT: control target
= control target key end

     0   :  { %v29_v0 = vlaneseq  ;;  %vm109_vm0 = vcmask 654336   ;;  %v565_v5 = vmov 0   ;;  %s663_s0 = inlined_call_operand.vmem [shape: f32[128,80], index: 0, kind: input, shape index: {}]   ;;  %s664_s1 = inlined_call_operand.vmem [shape: s32[2,128], index: 1, kind: input, shape index: {}]   ;;  %s665_s2 = inlined_call_operand.hbm [shape: f32[1,128], index: 2, kind: output, shape index: {}]  }
   0x1   :  { %v12_v1 = vld [vmem:[%s663_s0] sm:$0xff]  ;;  %539 = vset.pattern.permute.xlu0 %v565_v5  ;;  %v19_v6 = vld [vmem:[%s663_s0 + $0x38] sm:$0xff]  ;;  %540 = vset.pattern.permute.xlu1 %v565_v5  ;;  %v21_v7 = vld [vmem:[%s663_s0 + $0x48] sm:$0xff] }
   0x2   :  { %v28_v2 = vld [vmem:[%s664_s1] sm:$0x3]  ;;  %478 = vmatprep.mubr.msk.f32.mxu0 %vm109_vm0, %v12_v1  ;;  %v30_v3 = vshrl.u32 %v29_v0, 7  ;;  %91 = vperm.xlu0 %539, %v19_v6   ;;  %v22_v13 = vld [vmem:[%s663_s0 + $0x50] sm:$0xff] }
   0x3   :  { %v50_v4 = vadd.s32 32, %v28_v2  ;;  %101 = vperm.xlu1 %540, %v21_v7   ;;  %v20_v12 = vld [vmem:[%s663_s0 + $0x40] sm:$0xff] }
   0x4   :  { %v31_v8 = vadd.s32 8, %v30_v3  ;;  %v53_v9 = vsub.s32 0, %v30_v3  ;;  %v57_v10 = vsub.s32 1, %v30_v3  ;;  %v32_v11 = vadd.s32 16, %v30_v3 }
   0x5   :  { %v33_v14 = vadd.s32 24, %v30_v3  ;;  %v34_v17 = vadd.s32 32, %v30_v3  ;;  %v35_v18 = vadd.s32 40, %v30_v3 }
   0x6   :  { %v54_v15 = vrot.slane %v28_v2, %v53_v9  ;;  %v58_v16 = vrot.slane %v50_v4, %v57_v10 }
   0x7   :  { %7 = vsyncpa [#allocation3], 0  ;;  %96 = vperm.xlu0 %539, %v20_v12   ;;  %106 = vperm.xlu1 %540, %v22_v13   ;;  %v23_v19 = vld [vmem:[%s663_s0 + $0x58] sm:$0xff]  ;;  %v24_v20 = vld [vmem:[%s663_s0 + $0x60] sm:$0xff]  ;;  %v566_v21 = vmov 1.0|1.0  }
   0x8   :  { %vm69_vm1 = vcmp.eq.s32.totalorder %v30_v3, %v54_v15  ;;  %vm70_vm2 = vcmp.eq.s32.totalorder %v31_v8, %v54_v15  ;;  %vm71_vm3 = vcmp.eq.s32.totalorder %v32_v11, %v54_v15  ;;  %vm72_vm4 = vcmp.eq.s32.totalorder %v33_v14, %v54_v15  ;;  %v25_v25 = vld [vmem:[%s663_s0 + $0x68] sm:$0xff]  ;;  %v26_v26 = vld [vmem:[%s663_s0 + $0x70] sm:$0xff]  ;;  %v27_v29 = vld [vmem:[%s663_s0 + $0x78] sm:$0x1]  ;;  %s570_s14 = smov [#allocation2]  }
   0x9   :  { %vm502_vm5 = vmpackc.low %vm70_vm2, %vm69_vm1  ;;  %vm73_vm7 = vcmp.eq.s32.totalorder %v34_v17, %v58_v16  ;;  %vm74_vm8 = vcmp.eq.s32.totalorder %v35_v18, %v58_v16  ;;  %v36_v23 = vadd.s32 48, %v30_v3  ;;  %v37_v24 = vadd.s32 56, %v30_v3  ;;  %v13_v30 = vld [vmem:[%s663_s0 + $0x8] sm:$0xff]  ;;  %v14_v31 = vld [vmem:[%s663_s0 + $0x10] sm:$0xff]  ;;  %s410_s15 = sshll.u32 %s570_s14, 4  ;;  %s411_s15 = int_to_ptr.vmem [resolvable:$true] %s410_s15 }
   0xa   :  { %503 = vmatprep.subr.msk.bf16.mxu0 %vm502_vm5, %v566_v21  ;;  %vm611_vm6 = vmpackc.low %vm72_vm4, %vm71_vm3  ;;  %v38_v27 = vadd.s32 64, %v30_v3  ;;  %v39_v28 = vadd.s32 72, %v30_v3  ;;  %v15_v32 = vld [vmem:[%s663_s0 + $0x18] sm:$0xff]  ;;  %v16_v33 = vld [vmem:[%s663_s0 + $0x20] sm:$0xff]  ;;  %vm221_vm1 = vcmask 261120   ;;  %v567_v53 = vmov 0.0|0.0   ;;  %p546_p1 = scmp.lt.s32.totalorder %s411_s15, %s411_s15 }
   0xb   :  { %505 = vmatpush3.bf16.msk.msra.mxu0 %vm502_vm5, %v566_v21  ;;  %213 = vperm.xlu0 %539, %v23_v19   ;;  %vm510_vm9 = vmpackc.low %vm74_vm8, %vm73_vm7  ;;  %vm75_vm10 = vcmp.eq.s32.totalorder %v36_v23, %v58_v16  ;;  %vm76_vm11 = vcmp.eq.s32.totalorder %v37_v24, %v58_v16  ;;  %v17_v52 = vld [vmem:[%s663_s0 + $0x28] sm:$0xff]  ;;  %v569_v54 = vmov 0.0   ;;  %v18_v0 = vld [vmem:[%s663_s0 + $0x30] sm:$0xff]  ;;  %vm310_vm2 = vcmask 130048   ;;  %s541_s0 = scalar_lea.vmem %s411_s15, 16  ;;  %s545_s16 = scalar_lea.vmem %s411_s15, 32 }
   0xc   :  { %507 = vmatprep.subr.msk.bf16.mxu0 %vm611_vm6, %v566_v21  ;;  %218 = vperm.xlu1 %540, %v24_v20   ;;  %vm514_vm12 = vmpackc.low %vm76_vm11, %vm75_vm10  ;;  %vm77_vm13 = vcmp.eq.s32.totalorder %v38_v27, %v58_v16  ;;  %vm78_vm14 = vcmp.eq.s32.totalorder %v39_v28, %v58_v16  ;;  %p542_p0 = scmp.ne.s32.totalorder %s411_s15, %s541_s0  ;;  %p547_p2 = scmp.lt.s32.totalorder %s545_s16, %s541_s0 }
   0xd   :  { %vm518_vm15 = vmpackc.low %vm78_vm14, %vm77_vm13  ;;  %492 = vmatprep.mubr.msk.f32.mxu1 %vm221_vm1, %v16_v33 }
   0xe   :  { %p548_p3 = por %p547_p2, %p546_p1 }
   0xf   :  { %509 = vmatpush3.bf16.msk.msra.mxu0 %vm611_vm6, %v566_v21  ;;  %307 = vperm.xlu0 %539, %v25_v25  }
  0x10   :  { %511 = vmatprep.subr.msk.bf16.mxu0 %vm510_vm9, %v566_v21  ;;  %387 = vperm.xlu1 %540, %v26_v26   ;;  %p549_p4 = pnand %p548_p3, %p542_p0 }
  0x13   :  { %513 = vmatpush3.bf16.msk.msra.mxu0 %vm510_vm9, %v566_v21  ;;  %399 = vperm.xlu0 %539, %v27_v29  }
  0x14   :  { %515 = vmatprep.subr.msk.bf16.mxu0 %vm514_vm12, %v566_v21 }
  0x17   :  { %517 = vmatpush3.bf16.msk.msra.mxu0 %vm514_vm12, %v566_v21 }
  0x18   :  { %519 = vmatprep.subr.msk.bf16.mxu0 %vm518_vm15, %v566_v21 }
  0x1b   :  { %521 = vmatpush3.bf16.msk.msra.mxu0 %vm518_vm15, %v566_v21 }
  0x1e   :  { %479 = vmatmul.mubr.msk.f32.vlgmr.msra.gmra.mrb[0].mxu0 %vm109_vm0, %v13_v30 }
  0x1f   :  { %481 = vmatprep.mubr.msk.f32.mxu0 %vm109_vm0, %v14_v31 }
  0x22   :  { %482 = vmatmul.mubr.msk.f32.gmra.mrb[2].mxu0 %vm109_vm0, %v15_v32  ;;  %vm568_vm0 = vmmov 0  }
  0x81   :  { %v92_v34 = vpop.permute.xlu0 %91 }
  0x82   :  { %v102_v35 = vpop.permute.xlu1 %101 }
  0x86   :  { %v97_v36 = vpop.permute.xlu0 %96  ;;  %v107_v42 = vpop.permute.xlu1 %106 }
  0x8a   :  { %v214_v57 = vpop.permute.xlu0 %213 }
  0x8b   :  { %v219_v55 = vpop.permute.xlu1 %218 }
  0x8e   :  { %v308_v1 = vpop.permute.xlu0 %307 }
  0x8f   :  { %v388_v6 = vpop.permute.xlu1 %387 }
  0x92   :  { %v400_v14 = vpop.permute.xlu0 %399 }
  0xf1   :  { %v480_v37 = vpop.f32.mrb[0].mxu0 }
  0xf2   :  { %v194_v38 = vadd.f32 %v480_v37, %v97_v36  ;;  %v188_v39 = vpop.f32.mrb[1].mxu0 }
  0xf3   :  { %v189_v40 = vadd.f32 %v188_v39, %v92_v34 }
  0xf4   :  { %v208_v41 = vmax.f32 %v194_v38, 0.0 }
  0xf5   :  { %v207_v43 = vmax.f32 %v189_v40, 0.0  ;;  %v483_v44 = vpop.f32.mrb[2].mxu0 }
  0xf6   :  { %v204_v45 = vadd.f32 %v483_v44, %v107_v42  ;;  %v198_v46 = vpop.f32.mrb[3].mxu0 }
  0xf7   :  { %v199_v47 = vadd.f32 %v198_v46, %v102_v35  ;;  %v522_v48 = vpack.c.bf16 %v208_v41, %v207_v43 }
  0xf8   :  { %v210_v49 = vmax.f32 %v204_v45, 0.0 }
  0xf9   :  { %v209_v50 = vmax.f32 %v199_v47, 0.0  ;;  %523 = vmatprep.subr.bf16.mxu1 %v522_v48 }
  0xfa   :  { %525 = vmatpush3.bf16.msra.mxu1 %v522_v48 }
  0xfb   :  { %v526_v51 = vpack.c.bf16 %v210_v49, %v209_v50 }
  0xfd   :  { %527 = vmatprep.subr.bf16.mxu1 %v526_v51 }
  0xfe   :  { %529 = vmatpush3.bf16.msra.mxu1 %v526_v51 }
  0xff   :  { %530 = vmatprep.subr.bf16.mxu1 %v567_v53 }
 0x101   :  { %493 = vmatmul.mubr.msk.f32.vlgmr.msra.gmra.mrb[0].mxu1 %vm221_vm1, %v17_v52 }
 0x102   :  { %499 = vmatprep.mubr.msk.f32.mxu1 %vm568_vm0, %v569_v54 }
 0x1d4   :  { %v494_v56 = vpop.f32.mrb[0].mxu1 }
 0x1d5   :  { %v300_v58 = vadd.f32 %v494_v56, %v219_v55  ;;  %v294_v59 = vpop.f32.mrb[1].mxu1 }
 0x1d6   :  { %v295_v60 = vadd.f32 %v294_v59, %v214_v57 }
 0x1d7   :  { %v304_v61 = vmax.f32 %v300_v58, 0.0 }
 0x1d8   :  { %v303_v62 = vmax.f32 %v295_v60, 0.0 }
 0x1da   :  { %v531_v63 = vpack.c.bf16 %v304_v61, %v303_v62 }
 0x1dc   :  { %532 = vmatpush3.bf16.msra.mxu1 %v531_v63 }
 0x1df   :  { %500 = vmatmul.mubr.msk.f32.vlgmr.msra.gmra.mrb[2].mxu1 %vm310_vm2, %v18_v0 }
 0x2b2   :  { %v380_v2 = vpop.f32.mrb[2].mxu1 }
 0x2b3   :  { %v381_v3 = vadd.f32 %v380_v2, %v308_v1  ;;  %v501_v4 = vpop.f32.mrb[3].mxu1 }
 0x2b5   :  { %v384_v5 = vmax.f32 %v381_v3, 0.0 }
 0x2b7   :  { %v390_v7 = vmul.f32 %v388_v6, %v384_v5 }
 0x2b9   :  { %v391_v8 = vrot.slane %v390_v7, 4 }
 0x2bb   :  { %v392_v9 = vadd.f32 %v391_v8, %v390_v7 }
 0x2bd   :  { %v393_v10 = vrot.slane %v392_v9, 2 }
 0x2bf   :  { %v394_v11 = vadd.f32 %v393_v10, %v392_v9 }
 0x2c1   :  { %v395_v12 = vrot.slane %v394_v11, 1 }
 0x2c3   :  { %v396_v13 = vadd.f32 %v395_v12, %v394_v11 }
 0x2c5   :  { %v402_v15 = vadd.f32 %v400_v14, %v396_v13 }
 0x2c7   :  { %403 = vst [vmem:[#allocation2] sm:$0x1] %v402_v15 }
 0x2c8   :  { %552 = shalt.err (!%p549_p4)
}
 0x2c9   :  { %s553_s18 = scalar_lea.hbm %s665_s2, 16 }
 0x2ca   :  { %p554_p5 = scmp.ne.s32.totalorder %s665_s2, %s553_s18  ;;  %p557_p6 = scmp.lt.u32.totalorder %s553_s18, %s665_s2 }
 0x2cc   :  { %p559_p7 = pnand %p557_p6, %p554_p5 }
 0x2ce   :  { %562 = shalt.err (!%p559_p7)
}
 0x2cf   :  { %413 = dma.vmem_to_hbm [thread:$0]  %s411_s15, 16, %s665_s2, [#allocation3]  }
 0x2d0   :  { %563 = dma.done.wait [#allocation3], 16  }
 0x2d1   :  { %564 = vsyncadd [#allocation3], 4294967280 }
 0x2d2   :  { %417 = vsyncpa [#allocation3], 1 }

</bundles_post_ra>
